<compile_context>
chip_gen: v7x
topology: tpu7x:2x2x1
jax: 0.10.0
libtpu: 0.0.40
codegen_flags: <defaults>
</compile_context>

<pallas_src>
import functools

import jax
import jax.numpy as jnp
from jax.experimental import pallas as pl
from jax.experimental.pallas import tpu as pltpu


def matmul_kernel(lhs_ref, w_ref, o_ref, *, other):
    """Pure MXU matmul: o[M, Cout] = lhs[M, K] @ w[K, Cout] (+ other)."""
    acc = jnp.dot(lhs_ref[...], w_ref[...], preferred_element_type=jnp.float32)
    if other != 0.0:
        acc = acc + jnp.float32(other)
    o_ref[...] = acc


def _pick_block_m(m):
    # One full block at small M; tile (parallel grid axis) once M grows.
    for bm in (512, 256, 128):
        if m >= bm and m % bm == 0:
            return bm
    return m


def conv2d_s2_p1_plus_other(x_nchw, w_oihw, other=0.0):
    """Conv2d(Cin->Cout, 3x3, stride=2, padding=1, bias=False)(x) + other."""
    N, Cin, H, W = x_nchw.shape
    Cout, Cin_w, KH, KW = w_oihw.shape
    assert Cin == Cin_w and KH == 3 and KW == 3
    OH = (H + 2 - 3) // 2 + 1
    OW = (W + 2 - 3) // 2 + 1
    M = N * OH * OW
    K = 9 * Cin
    Kp = ((K + 127) // 128) * 128          # lane-align the contraction dim (288 -> 384)

    # ---- XLA-side glue (fuses into one fusion): pad + stride-2 im2col + bf16 cast ----
    x = jnp.transpose(x_nchw, (0, 2, 3, 1))                     # (N, H, W, Cin)
    x = jnp.pad(x, ((0, 0), (1, 1), (1, 1), (0, 0)))            # (N, H+2, W+2, Cin)
    taps = []
    for kh in range(3):
        for kw in range(3):
            taps.append(x[:, kh:kh + 2 * OH:2, kw:kw + 2 * OW:2, :])   # (N, OH, OW, Cin)
    lhs = jnp.concatenate(taps, axis=-1).reshape(M, K)          # (M, 9*Cin)
    if Kp != K:
        lhs = jnp.pad(lhs, ((0, 0), (0, Kp - K)))
    lhs = lhs.astype(jnp.bfloat16)                              # bf16 operands, f32 acc

    # Weights -> (K, Cout), K ordered (kh, kw, ci) to match the tap concat above.
    w_t = jnp.transpose(w_oihw, (2, 3, 1, 0)).reshape(K, Cout)
    if Kp != K:
        w_t = jnp.pad(w_t, ((0, Kp - K), (0, 0)))
    w_t = w_t.astype(jnp.bfloat16)

    # TODO(synk): `other` is baked as a compile-time scalar (module default is 0);
    # a tensor-valued `other` would need an extra VMEM operand + broadcast add.
    kernel = functools.partial(matmul_kernel, other=float(other))

    block_m = _pick_block_m(M)
    grid = (M // block_m,)

    out_flat = pl.pallas_call(
        kernel,
        out_shape=jax.ShapeDtypeStruct((M, Cout), jnp.float32),
        grid=grid,
        in_specs=[
            pl.BlockSpec((block_m, Kp), lambda i: (i, 0)),
            pl.BlockSpec((Kp, Cout), lambda i: (0, 0)),
        ],
        out_specs=pl.BlockSpec((block_m, Cout), lambda i: (i, 0)),
        compiler_params=pltpu.CompilerParams(
            dimension_semantics=("parallel",),
        ),
    )(lhs, w_t)

    # (M, Cout) -> (N, OH, OW, Cout) -> NCHW (single small XLA transpose).
    return jnp.transpose(out_flat.reshape(N, OH, OW, Cout), (0, 3, 1, 2))


if __name__ == "__main__":
    key = jax.random.PRNGKey(0)
    kx, kw = jax.random.split(key)

    N, Cin, H, W = 2, 32, 16, 16
    Cout = 64

    x = jax.random.normal(kx, (N, Cin, H, W), dtype=jnp.float32)
    fan_in = Cin * 3 * 3
    w = jax.random.normal(kw, (Cout, Cin, 3, 3), dtype=jnp.float32) / jnp.sqrt(fan_in)
    other = 0.0  # matches forward(input_x, other=0)

    fwd = jax.jit(lambda xx, ww: conv2d_s2_p1_plus_other(xx, ww, other))
    out = jax.block_until_ready(fwd(x, w))

    # self-check against XLA f32 conv (same NCHW/OIHW convention as PyTorch).
    ref = jax.lax.conv_general_dilated(
        x, w, window_strides=(2, 2), padding=((1, 1), (1, 1)),
        dimension_numbers=("NCHW", "OIHW", "NCHW"),
    ) + other
    assert out.shape == (N, Cout, (H + 1) // 2, (W + 1) // 2), out.shape
    # bf16 MXU operands (f32 accumulation) vs f32 reference -> loose tolerance.
    max_err = float(jnp.max(jnp.abs(out - ref)))
    assert jnp.allclose(out, ref, atol=5e-2, rtol=5e-2), max_err

    print("KERNEL_OK")
</pallas_src>

<mosaic_0001>
module attributes {stable_mosaic.version = 11 : i64} {
  func.func @matmul_kernel(%arg0: i32, %arg1: memref<128x384xbf16, #tpu.memory_space<vmem>>, %arg2: memref<384x64xbf16, #tpu.memory_space<vmem>>, %arg3: memref<128x64xf32, #tpu.memory_space<vmem>>) attributes {dimension_semantics = [#tpu.dimension_semantics<parallel>], iteration_bounds = array<i64: 1>, scalar_prefetch = 0 : i64, scratch_operands = 0 : i64, tpu.core_type = #tpu.core_type<tc>, window_params = [{transform_indices = @transform_0, window_bounds = array<i64: 128, 384>}, {pipeline_mode = #tpu.pipeline_mode<synchronous>, transform_indices = @transform_1, window_bounds = array<i64: 384, 64>}, {transform_indices = @transform_2, window_bounds = array<i64: 128, 64>}]} {
    %c0 = arith.constant 0 : index
    %c0_0 = arith.constant 0 : index
    %0 = vector.load %arg1[%c0, %c0_0] : memref<128x384xbf16, #tpu.memory_space<vmem>>, vector<128x384xbf16>
    %c0_1 = arith.constant 0 : index
    %c0_2 = arith.constant 0 : index
    %1 = vector.load %arg2[%c0_1, %c0_2] : memref<384x64xbf16, #tpu.memory_space<vmem>>, vector<384x64xbf16>
    %cst = arith.constant dense<0.000000e+00> : vector<128x64xf32>
    %2 = tpu.matmul %0, %1, %cst {dimension_numbers = #tpu.dot_dimension_numbers<[1], [0], [0], [1], [0, 0, 1, 1], [], []>} : vector<128x384xbf16>, vector<384x64xbf16>, vector<128x64xf32> -> vector<128x64xf32>
    %c0_3 = arith.constant 0 : index
    %c0_4 = arith.constant 0 : index
    %3 = vector.load %arg3[%c0_3, %c0_4] : memref<128x64xf32, #tpu.memory_space<vmem>>, vector<128x64xf32>
    tpu.vector_store %arg3[%c0_3, %c0_4], %2 {strides = array<i32>} : memref<128x64xf32, #tpu.memory_space<vmem>>, vector<128x64xf32>,
    return
  }
  func.func @transform_0(%arg0: i32) -> (i32, i32) {
    %c0_i32 = arith.constant 0 : i32
    %c0_i32_0 = arith.constant 0 : i32
    return %arg0, %c0_i32 : i32, i32
  }
  func.func @transform_1(%arg0: i32) -> (i32, i32) {
    %c0_i32 = arith.constant 0 : i32
    %c0_i32_0 = arith.constant 0 : i32
    %c0_i32_1 = arith.constant 0 : i32
    return %c0_i32, %c0_i32_0 : i32, i32
  }
  func.func @transform_2(%arg0: i32) -> (i32, i32) {
    %c0_i32 = arith.constant 0 : i32
    %c0_i32_0 = arith.constant 0 : i32
    return %arg0, %c0_i32 : i32, i32
  }
}

</mosaic_0001>

<bundles_post_ra>
// kernel: _lambda_.1
= control target key start
LH: loop header
LB: loop body
LE: loop exit
PB: predicated region body
PF: predicated region fallthrough
CT: control target
= control target key end

     0   :  { %s1025_s0 = inlined_call_operand.vmem [shape: bf16[128,384], index: 0, kind: input, shape index: {}]   ;;  %s1026_s1 = inlined_call_operand.vmem [shape: bf16[384,64], index: 1, kind: input, shape index: {}]   ;;  %s1027_s2 = inlined_call_operand.hbm [shape: f32[128,64], index: 2, kind: output, shape index: {}]  }
   0x1   :  { %v755_v0 = vld [vmem:[%s1026_s1 + $0x40] sm:$0xff]   ;;  %v758_v3 = vld [vmem:[%s1026_s1 + $0x48] sm:$0xff]   ;;  %v761_v6 = vld [vmem:[%s1026_s1 + $0x50] sm:$0xff]  }
   0x2   :  { %v756_v1 = vld [vmem:[%s1026_s1] sm:$0xff]   ;;  %640 = vmatprep.subr.bf16.mxu0 %v755_v0  ;;  %v759_v4 = vld [vmem:[%s1026_s1 + $0x8] sm:$0xff]   ;;  %v762_v7 = vld [vmem:[%s1026_s1 + $0x10] sm:$0xff]  }
   0x3   :  { %v757_v2 = vld [vmem:[%s1026_s1 + $0x80] sm:$0xff]   ;;  %641 = vmatpush3.bf16.msra.mxu0 %v756_v1  ;;  %v760_v5 = vld [vmem:[%s1026_s1 + $0x88] sm:$0xff]   ;;  %v763_v8 = vld [vmem:[%s1026_s1 + $0x90] sm:$0xff]  }
   0x4   :  { %720 = vmatprep.subr.bf16.mxu1 %v757_v2  ;;  %642 = vmatprep.subr.bf16.mxu0 %v758_v3  ;;  %v764_v9 = vld [vmem:[%s1026_s1 + $0x58] sm:$0xff]   ;;  %v767_v12 = vld [vmem:[%s1026_s1 + $0x60] sm:$0xff]   ;;  %v770_v15 = vld [vmem:[%s1026_s1 + $0x68] sm:$0xff]  }
   0x5   :  { %721 = vmatpush3.bf16.msra.mxu1 %v757_v2  ;;  %v765_v10 = vld [vmem:[%s1026_s1 + $0x18] sm:$0xff]   ;;  %v769_v13 = vld [vmem:[%s1026_s1 + $0xa0] sm:$0xff]   ;;  %v772_v16 = vld [vmem:[%s1026_s1 + $0xa8] sm:$0xff]  }
   0x6   :  { %722 = vmatprep.subr.bf16.mxu1 %v760_v5  ;;  %v766_v11 = vld [vmem:[%s1026_s1 + $0x98] sm:$0xff]   ;;  %v768_v14 = vld [vmem:[%s1026_s1 + $0x20] sm:$0xff]   ;;  %v771_v17 = vld [vmem:[%s1026_s1 + $0x28] sm:$0xff]  }
   0x7   :  { %643 = vmatpush3.bf16.msra.mxu0 %v759_v4  ;;  %v773_v18 = vld [vmem:[%s1026_s1 + $0x70] sm:$0xff]   ;;  %v776_v21 = vld [vmem:[%s1026_s1 + $0x78] sm:$0xff]   ;;  %v779_v26 = vld [vmem:[%s1025_s0] ss:$12 sps:$4 sm:$0xff]  }
   0x8   :  { %644 = vmatprep.subr.bf16.mxu0 %v761_v6  ;;  %v774_v19 = vld [vmem:[%s1026_s1 + $0x30] sm:$0xff]   ;;  %v778_v22 = vld [vmem:[%s1026_s1 + $0xb8] sm:$0xff]   ;;  %v783_v28 = vld [vmem:[%s1025_s0 + $0x20] ss:$12 sps:$4 sm:$0xff]  }
   0x9   :  { %723 = vmatpush3.bf16.msra.mxu1 %v760_v5  ;;  %v775_v20 = vld [vmem:[%s1026_s1 + $0xb0] sm:$0xff]   ;;  %v777_v25 = vld [vmem:[%s1026_s1 + $0x38] sm:$0xff]  }
   0xa   :  { %724 = vmatprep.subr.bf16.mxu1 %v763_v8  ;;  %v781_v23 = vld [vmem:[%s1025_s0 + $0x4] ss:$12 sps:$4 sm:$0xff]   ;;  %v782_v24 = vld [vmem:[%s1025_s0 + $0x8] ss:$12 sps:$4 sm:$0xff]  }
   0xb   :  { %645 = vmatpush3.bf16.msra.mxu0 %v762_v7  ;;  %397 = vmatprep.mubr.bf16.mxu0 %v781_v23  ;;  %v784_v27 = vld [vmem:[%s1025_s0 + $0x1c] ss:$12 sps:$4 sm:$0xff]   ;;  %v790_v29 = vld [vmem:[%s1025_s0 + $0x38] ss:$12 sps:$4 sm:$0xff]   ;;  %v787_v31 = vld [vmem:[%s1025_s0 + $0x34] ss:$12 sps:$4 sm:$0xff]  }
   0xc   :  { %646 = vmatprep.subr.bf16.mxu0 %v764_v9  ;;  %736 = vmatprep.mubr.bf16.mxu1 %v782_v24  ;;  %v786_v30 = vld [vmem:[%s1025_s0 + $0x18] ss:$12 sps:$4 sm:$0xff]   ;;  %v791_v32 = vld [vmem:[%s1025_s0 + $0x50] ss:$12 sps:$4 sm:$0xff]   ;;  %v798_v33 = vld [vmem:[%s1025_s0 + $0x68] ss:$12 sps:$4 sm:$0xff]  }
   0xd   :  { %725 = vmatpush3.bf16.msra.mxu1 %v763_v8 }
   0xe   :  { %726 = vmatprep.subr.bf16.mxu1 %v766_v11 }
   0xf   :  { %647 = vmatpush3.bf16.msra.mxu0 %v765_v10 }
  0x10   :  { %648 = vmatprep.subr.bf16.mxu0 %v767_v12 }
  0x11   :  { %727 = vmatpush3.bf16.msra.mxu1 %v766_v11 }
  0x12   :  { %728 = vmatprep.subr.bf16.mxu1 %v769_v13 }
  0x13   :  { %649 = vmatpush3.bf16.msra.mxu0 %v768_v14 }
  0x14   :  { %650 = vmatprep.subr.bf16.mxu0 %v770_v15 }
  0x15   :  { %729 = vmatpush3.bf16.msra.mxu1 %v769_v13 }
  0x16   :  { %730 = vmatprep.subr.bf16.mxu1 %v772_v16 }
  0x17   :  { %651 = vmatpush3.bf16.msra.mxu0 %v771_v17 }
  0x18   :  { %652 = vmatprep.subr.bf16.mxu0 %v773_v18 }
  0x19   :  { %731 = vmatpush3.bf16.msra.mxu1 %v772_v16 }
  0x1a   :  { %732 = vmatprep.subr.bf16.mxu1 %v775_v20 }
  0x1b   :  { %653 = vmatpush3.bf16.msra.mxu0 %v774_v19 }
  0x1c   :  { %654 = vmatprep.subr.bf16.mxu0 %v776_v21 }
  0x1d   :  { %733 = vmatpush3.bf16.msra.mxu1 %v775_v20 }
  0x1e   :  { %734 = vmatprep.subr.bf16.mxu1 %v778_v22 }
  0x1f   :  { %655 = vmatpush3.bf16.msra.mxu0 %v777_v25 }
  0x21   :  { %735 = vmatpush3.bf16.msra.mxu1 %v778_v22 }
  0x22   :  { %398 = vmatmul.mubr.bf16.vlgmr.msra.gmra.mrb[0].mxu0 %v779_v26 }
  0x23   :  { %405 = vmatprep.mubr.bf16.mxu0 %v784_v27 }
  0x24   :  { %737 = vmatmul.mubr.bf16.vlgmr.msra.gmra.mrb[0].mxu1 %v783_v28 }
  0x25   :  { %740 = vmatprep.mubr.bf16.mxu1 %v790_v29 }
  0x2a   :  { %406 = vmatmul.mubr.bf16.gmra.mrb[4].mxu0 %v786_v30 }
  0x2b   :  { %7 = vsyncpa [#allocation3], 0  ;;  %413 = vmatprep.mubr.bf16.mxu0 %v787_v31  ;;  %v789_v34 = vld [vmem:[%s1025_s0 + $0x30] ss:$12 sps:$4 sm:$0xff]   ;;  %v792_v35 = vld [vmem:[%s1025_s0 + $0x4c] ss:$12 sps:$4 sm:$0xff]  }
  0x2c   :  { %741 = vmatmul.mubr.bf16.gmra.mrb[4].mxu1 %v791_v32  ;;  %v799_v36 = vld [vmem:[%s1025_s0 + $0x80] ss:$12 sps:$4 sm:$0xff]   ;;  %v806_v37 = vld [vmem:[%s1025_s0 + $0x98] ss:$12 sps:$4 sm:$0xff]   ;;  %v794_v38 = vld [vmem:[%s1025_s0 + $0x48] ss:$12 sps:$4 sm:$0xff]  }
  0x2d   :  { %744 = vmatprep.mubr.bf16.mxu1 %v798_v33  ;;  %v795_v39 = vld [vmem:[%s1025_s0 + $0x64] ss:$12 sps:$4 sm:$0xff]   ;;  %v797_v41 = vld [vmem:[%s1025_s0 + $0x60] ss:$12 sps:$4 sm:$0xff]   ;;  %v800_v42 = vld [vmem:[%s1025_s0 + $0x7c] ss:$12 sps:$4 sm:$0xff]  }
  0x2e   :  { %v807_v40 = vld [vmem:[%s1025_s0 + $0xb0] ss:$12 sps:$4 sm:$0xff]   ;;  %v802_v43 = vld [vmem:[%s1025_s0 + $0x78] ss:$12 sps:$4 sm:$0xff]   ;;  %v803_v44 = vld [vmem:[%s1025_s0 + $0x94] ss:$12 sps:$4 sm:$0xff]  }
  0x2f   :  { %v805_v45 = vld [vmem:[%s1025_s0 + $0x90] ss:$12 sps:$4 sm:$0xff]   ;;  %v808_v46 = vld [vmem:[%s1025_s0 + $0xac] ss:$12 sps:$4 sm:$0xff]   ;;  %v810_v47 = vld [vmem:[%s1025_s0 + $0xa8] ss:$12 sps:$4 sm:$0xff]  }
  0x30   :  { %vm559_vm0 = vcmask 523264   ;;  %s835_s0 = smov [#allocation2]  }
  0x31   :  { %s581_s19 = sshll.u32 %s835_s0, 4  ;;  %s582_s19 = int_to_ptr.vmem [resolvable:$true] %s581_s19 }
  0x32   :  { %414 = vmatmul.mubr.bf16.gmra.mrb[8].mxu0 %v789_v34  ;;  %s811_s20 = scalar_lea.vmem %s582_s19, 2048  ;;  %p816_p1 = scmp.lt.s32.totalorder %s582_s19, %s582_s19 }
  0x33   :  { %421 = vmatprep.mubr.bf16.mxu0 %v792_v35  ;;  %p812_p0 = scmp.ne.s32.totalorder %s582_s19, %s811_s20  ;;  %p817_p2 = scmp.lt.s32.totalorder %s811_s20, %s811_s20 }
  0x34   :  { %745 = vmatmul.mubr.bf16.gmra.mrb[8].mxu1 %v799_v36 }
  0x35   :  { %748 = vmatprep.mubr.bf16.mxu1 %v806_v37  ;;  %p818_p3 = por %p817_p2, %p816_p1 }
  0x37   :  { %p819_p4 = pnand %p818_p3, %p812_p0 }
  0x3a   :  { %422 = vmatmul.mubr.bf16.gmra.mrb[12].mxu0 %v794_v38 }
  0x3b   :  { %429 = vmatprep.mubr.bf16.mxu0 %v795_v39 }
  0x3c   :  { %749 = vmatmul.mubr.bf16.gmra.mrb[12].mxu1 %v807_v40 }
  0x42   :  { %430 = vmatmul.mubr.bf16.gmra.mrb[16].mxu0 %v797_v41 }
  0x43   :  { %437 = vmatprep.mubr.bf16.mxu0 %v800_v42 }
  0x4a   :  { %438 = vmatmul.mubr.bf16.gmra.mrb[20].mxu0 %v802_v43 }
  0x4b   :  { %445 = vmatprep.mubr.bf16.mxu0 %v803_v44 }
  0x52   :  { %446 = vmatmul.mubr.bf16.gmra.mrb[24].mxu0 %v805_v45 }
  0x53   :  { %453 = vmatprep.mubr.bf16.mxu0 %v808_v46 }
  0x5a   :  { %454 = vmatmul.mubr.bf16.gmra.mrb[28].mxu0 %v810_v47 }
  0xf5   :  { %v656_v48 = vpop.f32.mrb[0].mxu0 }
  0xf6   :  { %v657_v49 = vpop.f32.mrb[1].mxu0 }
  0xf7   :  { %v658_v50 = vadd.f32 %v657_v49, %v656_v48  ;;  %v659_v51 = vpop.f32.mrb[2].mxu0  ;;  %v738_v52 = vpop.f32.mrb[0].mxu1 }
  0xf8   :  { %v660_v53 = vpop.f32.mrb[3].mxu0  ;;  %v496_v54 = vpop.f32.mrb[1].mxu1 }
  0xf9   :  { %v661_v55 = vadd.f32 %v660_v53, %v659_v51  ;;  %v497_v56 = vadd.f32 %v658_v50, %v496_v54  ;;  %v739_v57 = vpop.f32.mrb[2].mxu1 }
  0xfa   :  { %v499_v58 = vpop.f32.mrb[3].mxu1 }
  0xfb   :  { %560 = vst.msk [vmem:[#allocation2] sm:$0xff] %vm559_vm0, %v497_v56  ;;  %v500_v59 = vadd.f32 %v661_v55, %v499_v58 }
  0xfd   :  { %561 = vst.msk [vmem:[#allocation2 + $0x8] sm:$0xff] %vm559_vm0, %v500_v59  ;;  %v662_v60 = vpop.f32.mrb[4].mxu0 }
  0xfe   :  { %v663_v61 = vpop.f32.mrb[5].mxu0 }
  0xff   :  { %v664_v62 = vadd.f32 %v663_v61, %v662_v60  ;;  %v665_v63 = vpop.f32.mrb[6].mxu0  ;;  %v742_v0 = vpop.f32.mrb[4].mxu1 }
 0x100   :  { %v666_v1 = vpop.f32.mrb[7].mxu0  ;;  %v512_v2 = vpop.f32.mrb[5].mxu1 }
 0x101   :  { %v505_v3 = vadd.f32 %v738_v52, %v664_v62  ;;  %v667_v4 = vadd.f32 %v666_v1, %v665_v63  ;;  %v743_v5 = vpop.f32.mrb[6].mxu1 }
 0x102   :  { %v515_v6 = vpop.f32.mrb[7].mxu1 }
 0x103   :  { %562 = vst.msk [vmem:[#allocation2 + $0x10] sm:$0xff] %vm559_vm0, %v505_v3  ;;  %v508_v7 = vadd.f32 %v739_v57, %v667_v4 }
 0x105   :  { %563 = vst.msk [vmem:[#allocation2 + $0x18] sm:$0xff] %vm559_vm0, %v508_v7  ;;  %v668_v8 = vpop.f32.mrb[8].mxu0 }
 0x106   :  { %v669_v9 = vpop.f32.mrb[9].mxu0 }
 0x107   :  { %v670_v10 = vadd.f32 %v669_v9, %v668_v8  ;;  %v671_v11 = vpop.f32.mrb[10].mxu0  ;;  %v746_v12 = vpop.f32.mrb[8].mxu1 }
 0x108   :  { %v672_v13 = vpop.f32.mrb[11].mxu0  ;;  %v528_v14 = vpop.f32.mrb[9].mxu1 }
 0x109   :  { %v673_v15 = vadd.f32 %v672_v13, %v671_v11  ;;  %v513_v16 = vadd.f32 %v670_v10, %v512_v2  ;;  %v747_v17 = vpop.f32.mrb[10].mxu1 }
 0x10a   :  { %v531_v18 = vpop.f32.mrb[11].mxu1 }
 0x10b   :  { %564 = vst.msk [vmem:[#allocation2 + $0x20] sm:$0xff] %vm559_vm0, %v513_v16  ;;  %v516_v19 = vadd.f32 %v673_v15, %v515_v6 }
 0x10d   :  { %565 = vst.msk [vmem:[#allocation2 + $0x28] sm:$0xff] %vm559_vm0, %v516_v19  ;;  %v674_v20 = vpop.f32.mrb[12].mxu0 }
 0x10e   :  { %v675_v21 = vpop.f32.mrb[13].mxu0 }
 0x10f   :  { %v676_v22 = vadd.f32 %v675_v21, %v674_v20  ;;  %v677_v23 = vpop.f32.mrb[14].mxu0  ;;  %v750_v24 = vpop.f32.mrb[12].mxu1 }
 0x110   :  { %v678_v25 = vpop.f32.mrb[15].mxu0  ;;  %v544_v26 = vpop.f32.mrb[13].mxu1 }
 0x111   :  { %v521_v27 = vadd.f32 %v742_v0, %v676_v22  ;;  %v679_v28 = vadd.f32 %v678_v25, %v677_v23  ;;  %v751_v29 = vpop.f32.mrb[14].mxu1 }
 0x112   :  { %v547_v30 = vpop.f32.mrb[15].mxu1 }
 0x113   :  { %566 = vst.msk [vmem:[#allocation2 + $0x30] sm:$0xff] %vm559_vm0, %v521_v27  ;;  %v524_v31 = vadd.f32 %v743_v5, %v679_v28 }
 0x115   :  { %567 = vst.msk [vmem:[#allocation2 + $0x38] sm:$0xff] %vm559_vm0, %v524_v31  ;;  %v680_v32 = vpop.f32.mrb[16].mxu0 }
 0x116   :  { %v681_v33 = vpop.f32.mrb[17].mxu0 }
 0x117   :  { %v682_v34 = vadd.f32 %v681_v33, %v680_v32  ;;  %v683_v35 = vpop.f32.mrb[18].mxu0 }
 0x118   :  { %v684_v36 = vpop.f32.mrb[19].mxu0 }
 0x119   :  { %v685_v37 = vadd.f32 %v684_v36, %v683_v35  ;;  %v529_v38 = vadd.f32 %v682_v34, %v528_v14 }
 0x11b   :  { %568 = vst.msk [vmem:[#allocation2 + $0x40] sm:$0xff] %vm559_vm0, %v529_v38  ;;  %v532_v39 = vadd.f32 %v685_v37, %v531_v18 }
 0x11d   :  { %569 = vst.msk [vmem:[#allocation2 + $0x48] sm:$0xff] %vm559_vm0, %v532_v39  ;;  %v686_v40 = vpop.f32.mrb[20].mxu0 }
 0x11e   :  { %v687_v41 = vpop.f32.mrb[21].mxu0 }
 0x11f   :  { %v688_v42 = vadd.f32 %v687_v41, %v686_v40  ;;  %v689_v43 = vpop.f32.mrb[22].mxu0 }
 0x120   :  { %v690_v44 = vpop.f32.mrb[23].mxu0 }
 0x121   :  { %v537_v45 = vadd.f32 %v746_v12, %v688_v42  ;;  %v691_v46 = vadd.f32 %v690_v44, %v689_v43 }
 0x123   :  { %570 = vst.msk [vmem:[#allocation2 + $0x50] sm:$0xff] %vm559_vm0, %v537_v45  ;;  %v540_v47 = vadd.f32 %v747_v17, %v691_v46 }
 0x125   :  { %571 = vst.msk [vmem:[#allocation2 + $0x58] sm:$0xff] %vm559_vm0, %v540_v47  ;;  %v692_v48 = vpop.f32.mrb[24].mxu0 }
 0x126   :  { %v693_v49 = vpop.f32.mrb[25].mxu0 }
 0x127   :  { %v694_v50 = vadd.f32 %v693_v49, %v692_v48  ;;  %v695_v51 = vpop.f32.mrb[26].mxu0 }
 0x128   :  { %v696_v52 = vpop.f32.mrb[27].mxu0 }
 0x129   :  { %v697_v53 = vadd.f32 %v696_v52, %v695_v51  ;;  %v545_v54 = vadd.f32 %v694_v50, %v544_v26 }
 0x12b   :  { %572 = vst.msk [vmem:[#allocation2 + $0x60] sm:$0xff] %vm559_vm0, %v545_v54  ;;  %v548_v55 = vadd.f32 %v697_v53, %v547_v30 }
 0x12d   :  { %573 = vst.msk [vmem:[#allocation2 + $0x68] sm:$0xff] %vm559_vm0, %v548_v55  ;;  %v698_v56 = vpop.f32.mrb[28].mxu0 }
 0x12e   :  { %v699_v57 = vpop.f32.mrb[29].mxu0 }
 0x12f   :  { %v700_v58 = vadd.f32 %v699_v57, %v698_v56  ;;  %v701_v59 = vpop.f32.mrb[30].mxu0 }
 0x130   :  { %v702_v60 = vpop.f32.mrb[31].mxu0 }
 0x131   :  { %v553_v61 = vadd.f32 %v750_v24, %v700_v58  ;;  %v703_v62 = vadd.f32 %v702_v60, %v701_v59 }
 0x133   :  { %574 = vst.msk [vmem:[#allocation2 + $0x70] sm:$0xff] %vm559_vm0, %v553_v61  ;;  %v556_v63 = vadd.f32 %v751_v29, %v703_v62 }
 0x135   :  { %575 = vst.msk [vmem:[#allocation2 + $0x78] sm:$0xff] %vm559_vm0, %v556_v63 }
 0x136   :  { %822 = shalt.err (!%p819_p4)
}
 0x137   :  { %s823_s23 = scalar_lea.hbm %s1027_s2, 2048 }
 0x138   :  { %p824_p5 = scmp.ne.s32.totalorder %s1027_s2, %s823_s23  ;;  %p827_p6 = scmp.lt.u32.totalorder %s823_s23, %s1027_s2 }
 0x13a   :  { %p829_p7 = pnand %p827_p6, %p824_p5 }
 0x13c   :  { %832 = shalt.err (!%p829_p7)
}
 0x13d   :  { %s836_s28 = smov 128   ;;  %s837_s29 = smov 8  }
 0x13e   :  { %587 = dma.vmem_to_hbm [thread:$0]  %s582_s19, 2048, %s1027_s2, [#allocation3], %s836_s28, %s836_s28, %s837_s29  }
 0x13f   :  { %833 = dma.done.wait [#allocation3], 2048  }
 0x140   :  { %834 = vsyncadd [#allocation3], 4294965248 }
 0x141   :  { %591 = vsyncpa [#allocation3], 1 }

</bundles_post_ra>
